<compile_context>
chip_gen: v6e
topology: v6e:2x2x1
jax: 0.10.0
libtpu: 0.0.40
codegen_flags: <defaults>
</compile_context>

<pallas_src>
import functools

import jax
import jax.numpy as jnp
import numpy as np
from jax import lax
from jax.experimental import pallas as pl
from jax.experimental.pallas import tpu as pltpu


def _round_up(x, m):
    return ((x + m - 1) // m) * m


def _nconv_kernel(x_ref, a_ref, o_ref, xt_ref, y_ref, *, block_rows, l_pad):
    """One grid step: propagate `block_rows` (n,c) slabs through one support A.

    x_ref : (B, V, L)        activations, native layout (nodes on sublanes)
    a_ref : (1, V, W)        support matrix (resident across the inner grid axis)
    o_ref : (B, W, L)        propagated activations, native layout
    xt_ref: (B*Lp, V)  f32   scratch: x relaid out so the contraction dim V is on lanes
    y_ref : (B*Lp, W)  f32   scratch: f32 matmul result (output nodes W on lanes)
    """
    L = x_ref.shape[-1]

    if l_pad != L:
        # Pad rows of xt feed the matmul but their results are never read back;
        # zero them anyway so uninitialized VMEM never enters the MXU.
        xt_ref[...] = jnp.zeros(xt_ref.shape, xt_ref.dtype)

    # 1) In-VMEM relayout (XLU): per slab, (V, L) -> (L, V), upcast to f32.
    def fill(b, carry):
        off = pl.multiple_of(b * l_pad, l_pad)
        xt_ref[pl.ds(off, L), :] = x_ref[b].astype(jnp.float32).T
        return carry

    lax.fori_loop(0, block_rows, fill, 0)

    # 2) One coarse MXU matmul: rows = (slab, time), lanes = output nodes W.
    y_ref[...] = jnp.dot(xt_ref[...], a_ref[0],
                         preferred_element_type=jnp.float32)

    # 3) Relayout back (L, W) -> (W, L) per slab and store in native layout.
    def drain(b, carry):
        off = pl.multiple_of(b * l_pad, l_pad)
        o_ref[b] = y_ref[pl.ds(off, L), :].T.astype(o_ref.dtype)
        return carry

    lax.fori_loop(0, block_rows, drain, 0)


def _choose_block_rows(R, V, W, L, l_pad, itemsize, *, max_rows, vmem_budget):
    """Largest divisor of R whose padded VMEM footprint fits the budget.

    Prefers choices giving >= 2 grid steps so both v7x TensorCores get work.
    Footprints use the tiled in-VMEM sizes (minor dim padded to 128 lanes).
    """
    def footprint(b):
        x_blk = b * _round_up(V, 8) * _round_up(L, 128) * itemsize
        o_blk = b * _round_up(W, 8) * _round_up(L, 128) * itemsize
        a_blk = _round_up(V, 8) * _round_up(W, 128) * 4
        xt = _round_up(b * l_pad, 8) * _round_up(V, 128) * 4
        ym = _round_up(b * l_pad, 8) * _round_up(W, 128) * 4
        return 2 * (x_blk + o_blk + a_blk) + xt + ym   # in/out double-buffered

    feasible = [b for b in range(1, min(R, max_rows) + 1)
                if R % b == 0 and footprint(b) <= vmem_budget]
    if not feasible:
        return 1
    multi_step = [b for b in feasible if R // b >= 2]
    return max(multi_step) if multi_step else max(feasible)


def nconv(x, A, *, max_block_rows=512, vmem_budget_bytes=24 * 1024 * 1024):
    """GraphWaveNet nconv forward.

    x: (N, C, V, L);  A: (V, W) or (N, V, W).  Returns (N, C, W, L) in x.dtype.
    Pass bf16 `x` for the bandwidth-optimal path on v6e/v7x (accumulation is
    always f32 inside the kernel).
    """
    N, C, V, L = x.shape
    batched = A.ndim == 3
    W = A.shape[-1]
    assert A.shape[-2] == V
    if batched:
        assert A.shape[0] == N

    out_dtype = x.dtype
    # A is tiny (V*W); keep it f32 so accumulation quality never depends on it.
    a3 = A.astype(jnp.float32)
    if not batched:
        a3 = a3[None]                       # (1, V, W), resident across the grid
    G = N if batched else 1                 # grid axis that selects the support
    R = C if batched else N * C             # (n, c) slabs handled per support

    # Metadata-only reshape (collapse leading dims); no HBM pass, no transpose.
    x3 = x.reshape(G * R, V, L)

    l_pad = _round_up(L, 8)
    B = _choose_block_rows(R, V, W, L, l_pad, x.dtype.itemsize,
                           max_rows=max_block_rows,
                           vmem_budget=vmem_budget_bytes)
    steps = R // B

    x_index = lambda g, r: (g * steps + r, 0, 0)
    a_index = (lambda g, r: (g, 0, 0)) if batched else (lambda g, r: (0, 0, 0))

    kernel = functools.partial(_nconv_kernel, block_rows=B, l_pad=l_pad)

    cost = pl.CostEstimate(
        flops=2 * N * C * V * W * L,
        transcendentals=0,
        bytes_accessed=(x.size * x.dtype.itemsize
                        + a3.size * 4
                        + N * C * W * L * jnp.dtype(out_dtype).itemsize),
    )

    out3 = pl.pallas_call(
        kernel,
        out_shape=jax.ShapeDtypeStruct((G * R, W, L), out_dtype),
        grid_spec=pltpu.PrefetchScalarGridSpec(
            num_scalar_prefetch=0,
            grid=(G, steps),
            in_specs=[
                pl.BlockSpec((B, V, L), x_index),
                pl.BlockSpec((1, V, W), a_index),
            ],
            out_specs=pl.BlockSpec((B, W, L), x_index),
            scratch_shapes=[
                pltpu.VMEM((B * l_pad, V), jnp.float32),
                pltpu.VMEM((B * l_pad, W), jnp.float32),
            ],
        ),
        compiler_params=pltpu.CompilerParams(
            dimension_semantics=("parallel", "parallel"),
            vmem_limit_bytes=32 * 1024 * 1024,
        ),
        cost_estimate=cost,
    )(x3, a3)

    return out3.reshape(N, C, W, L)


def nconv_reference(x, A):
    """Pure-JAX reference mirroring the PyTorch module."""
    if A.ndim == 3:
        return jnp.einsum("ncvl,nvw->ncwl", x, A)
    return jnp.einsum("ncvl,vw->ncwl", x, A)


if __name__ == "__main__":
    # Small shapes consistent with the module: batch=2, channels=4, nodes=16, seq=8.
    N, C, V, L = 2, 4, 16, 8

    key = jax.random.PRNGKey(0)
    kx, ka, kb = jax.random.split(key, 3)

    x = jax.random.normal(kx, (N, C, V, L), dtype=jnp.float32)
    # Row-normalized, non-negative adjacency-like supports.
    raw2 = jax.random.uniform(ka, (V, V), dtype=jnp.float32)
    A2 = raw2 / jnp.sum(raw2, axis=-1, keepdims=True)
    raw3 = jax.random.uniform(kb, (N, V, V), dtype=jnp.float32)
    A3 = raw3 / jnp.sum(raw3, axis=-1, keepdims=True)

    # Shared (2-D) support, f32 activations.
    y2 = jax.block_until_ready(nconv(x, A2))
    np.testing.assert_allclose(
        np.asarray(y2), np.asarray(nconv_reference(x, A2)), rtol=1e-3, atol=1e-3
    )
    assert y2.shape == (N, C, V, L)

    # Per-batch (3-D) support, f32 activations.
    y3 = jax.block_until_ready(nconv(x, A3))
    np.testing.assert_allclose(
        np.asarray(y3), np.asarray(nconv_reference(x, A3)), rtol=1e-3, atol=1e-3
    )
    assert y3.shape == (N, C, V, L)

    # bf16 activations: bandwidth-optimal path (f32 accumulation in-kernel).
    x_bf16 = x.astype(jnp.bfloat16)
    y2b = jax.block_until_ready(nconv(x_bf16, A2))
    assert y2b.dtype == jnp.bfloat16
    np.testing.assert_allclose(
        np.asarray(y2b.astype(jnp.float32)),
        np.asarray(nconv_reference(x, A2)),
        rtol=3e-2, atol=3e-2,
    )

    print("KERNEL_OK")
</pallas_src>

<mosaic_0001>
module attributes {stable_mosaic.version = 11 : i64} {
  func.func @_nconv_kernel(%arg0: i32, %arg1: i32, %arg2: memref<4x16x8xf32, #tpu.memory_space<vmem>>, %arg3: memref<1x16x16xf32, #tpu.memory_space<vmem>>, %arg4: memref<4x16x8xf32, #tpu.memory_space<vmem>>, %arg5: memref<32x16xf32, #tpu.memory_space<vmem>>, %arg6: memref<32x16xf32, #tpu.memory_space<vmem>>) attributes {dimension_semantics = [#tpu.dimension_semantics<parallel>, #tpu.dimension_semantics<parallel>], iteration_bounds = array<i64: 1, 2>, scalar_prefetch = 0 : i64, scratch_operands = 2 : i64, tpu.core_type = #tpu.core_type<tc>, window_params = [{transform_indices = @transform_0, window_bounds = array<i64: 4, 16, 8>}, {pipeline_mode = #tpu.pipeline_mode<synchronous>, transform_indices = @transform_1, window_bounds = array<i64: 1, 16, 16>}, {transform_indices = @transform_2, window_bounds = array<i64: 4, 16, 8>}]} {
    %c0_i32 = arith.constant 0 : i32
    %c4_i32 = arith.constant 4 : i32
    %0 = arith.addi %c0_i32, %c4_i32 : i32
    %c1_i32 = arith.constant 1 : i32
    scf.for %arg7 = %c0_i32 to %0 step %c1_i32  : i32 {
      %c8_i32 = arith.constant 8 : i32
      %7 = arith.muli %arg7, %c8_i32 : i32
      %8 = tpu.assume_multiple %7, 8 : i32
      %9 = arith.index_cast %arg7 : i32 to index
      %c0_11 = arith.constant 0 : index
      %c0_12 = arith.constant 0 : index
      %10 = vector.load %arg2[%9, %c0_11, %c0_12] : memref<4x16x8xf32, #tpu.memory_space<vmem>>, vector<1x16x8xf32>
      %11 = vector.shape_cast %10 : vector<1x16x8xf32> to vector<16x8xf32>
      %12 = tpu.transpose %11, [1, 0] : vector<16x8xf32> -> vector<8x16xf32>
      %13 = arith.index_cast %8 : i32 to index
      %c0_13 = arith.constant 0 : index
      %14 = vector.load %arg5[%13, %c0_13] : memref<32x16xf32, #tpu.memory_space<vmem>>, vector<8x16xf32>
      tpu.vector_store %arg5[%13, %c0_13], %12 {strides = array<i32>} : memref<32x16xf32, #tpu.memory_space<vmem>>, vector<8x16xf32>,
    }
    %c4_i32_0 = arith.constant 4 : i32
    %c0 = arith.constant 0 : index
    %c0_1 = arith.constant 0 : index
    %1 = vector.load %arg5[%c0, %c0_1] : memref<32x16xf32, #tpu.memory_space<vmem>>, vector<32x16xf32>
    %c0_2 = arith.constant 0 : index
    %c0_3 = arith.constant 0 : index
    %c0_4 = arith.constant 0 : index
    %2 = vector.load %arg3[%c0_2, %c0_3, %c0_4] : memref<1x16x16xf32, #tpu.memory_space<vmem>>, vector<1x16x16xf32>
    %3 = vector.shape_cast %2 : vector<1x16x16xf32> to vector<16x16xf32>
    %cst = arith.constant dense<0.000000e+00> : vector<32x16xf32>
    %4 = tpu.matmul %1, %3, %cst {dimension_numbers = #tpu.dot_dimension_numbers<[1], [0], [0], [1], [0, 0, 1, 1], [], []>} : vector<32x16xf32>, vector<16x16xf32>, vector<32x16xf32> -> vector<32x16xf32>
    %c0_5 = arith.constant 0 : index
    %c0_6 = arith.constant 0 : index
    %5 = vector.load %arg6[%c0_5, %c0_6] : memref<32x16xf32, #tpu.memory_space<vmem>>, vector<32x16xf32>
    tpu.vector_store %arg6[%c0_5, %c0_6], %4 {strides = array<i32>} : memref<32x16xf32, #tpu.memory_space<vmem>>, vector<32x16xf32>,
    %c0_i32_7 = arith.constant 0 : i32
    %c4_i32_8 = arith.constant 4 : i32
    %6 = arith.addi %c0_i32_7, %c4_i32_8 : i32
    %c1_i32_9 = arith.constant 1 : i32
    scf.for %arg7 = %c0_i32_7 to %6 step %c1_i32_9  : i32 {
      %c8_i32 = arith.constant 8 : i32
      %7 = arith.muli %arg7, %c8_i32 : i32
      %8 = tpu.assume_multiple %7, 8 : i32
      %9 = arith.index_cast %8 : i32 to index
      %c0_11 = arith.constant 0 : index
      %10 = vector.load %arg6[%9, %c0_11] : memref<32x16xf32, #tpu.memory_space<vmem>>, vector<8x16xf32>
      %11 = tpu.transpose %10, [1, 0] : vector<8x16xf32> -> vector<16x8xf32>
      %12 = arith.index_cast %arg7 : i32 to index
      %c0_12 = arith.constant 0 : index
      %c0_13 = arith.constant 0 : index
      %13 = vector.load %arg4[%12, %c0_12, %c0_13] : memref<4x16x8xf32, #tpu.memory_space<vmem>>, vector<1x16x8xf32>
      %14 = vector.shape_cast %13 : vector<1x16x8xf32> to vector<16x8xf32>
      %15 = vector.shape_cast %11 : vector<16x8xf32> to vector<1x16x8xf32>
      tpu.vector_store %arg4[%12, %c0_12, %c0_13], %15 {strides = array<i32>} : memref<4x16x8xf32, #tpu.memory_space<vmem>>, vector<1x16x8xf32>,
    }
    %c4_i32_10 = arith.constant 4 : i32
    return
  }
  func.func @transform_0(%arg0: i32, %arg1: i32) -> (i32, i32, i32) {
    %c2_i32 = arith.constant 2 : i32
    %0 = arith.muli %arg0, %c2_i32 : i32
    %1 = arith.addi %0, %arg1 : i32
    %c0_i32 = arith.constant 0 : i32
    %c0_i32_0 = arith.constant 0 : i32
    %c0_i32_1 = arith.constant 0 : i32
    return %1, %c0_i32, %c0_i32_0 : i32, i32, i32
  }
  func.func @transform_1(%arg0: i32, %arg1: i32) -> (i32, i32, i32) {
    %c0_i32 = arith.constant 0 : i32
    %c0_i32_0 = arith.constant 0 : i32
    %c0_i32_1 = arith.constant 0 : i32
    %c0_i32_2 = arith.constant 0 : i32
    return %c0_i32, %c0_i32_0, %c0_i32_1 : i32, i32, i32
  }
  func.func @transform_2(%arg0: i32, %arg1: i32) -> (i32, i32, i32) {
    %c2_i32 = arith.constant 2 : i32
    %0 = arith.muli %arg0, %c2_i32 : i32
    %1 = arith.addi %0, %arg1 : i32
    %c0_i32 = arith.constant 0 : i32
    %c0_i32_0 = arith.constant 0 : i32
    %c0_i32_1 = arith.constant 0 : i32
    return %1, %c0_i32, %c0_i32_0 : i32, i32, i32
  }
}

</mosaic_0001>

<bundles_post_ra>
// kernel: tpu_custom_call.1
= control target key start
LH: loop header
LB: loop body
LE: loop exit
PB: predicated region body
PF: predicated region fallthrough
CT: control target
= control target key end

     0   :  { %s619_s9 = smov 0   ;;  %s621_s10 = smov 0   ;;  %s670_s0 = inlined_call_operand.vmem [shape: f32[8,16,8], index: 0, kind: input, shape index: {}]   ;;  %s671_s1 = inlined_call_operand.vmem [shape: f32[1,16,16], index: 1, kind: input, shape index: {}]   ;;  %s672_s2 = inlined_call_operand.vmem [shape: f32[8,16,8], index: 2, kind: output, shape index: {}]  }
   0x1   :  { %s623_s11 = smov 0  }
   0x2 LB: > { %s21_s12 = sadd.s32 1, %s590_s10  ;;  %p483_p0 = scmp.ge.s32.totalorder %s594_s11, 1  ;;  %s594_s11 = sphi %s623_s11, %s12_s11   ;;  %s590_s10 = sphi %s621_s10, %s674_s10   ;;  %s586_s9 = sphi %s619_s9, %s673_s9  }
   0x3   : > { %p22_p1 = scmp.ge.s32.totalorder %s21_s12, 2  ;;  %p138_p2 = scmp.lt.s32.totalorder %s594_s11, 3 }
   0x5   : > { %s676_s12 = smov (%p22_p1, %s21_s12), 0  ;;  %p139_p3 = pnand %p483_p0, %p138_p2 }
   0x6   : > { %s484_s13 = sshll.u32 (!%p139_p3), %s586_s9, 2  ;;  %s596_s21 = smov (!%p139_p3), 0  }
   0x7   : > { %142 = sbr.rel (%p139_p3) target bundleno = 485 (0x1e5), region = 28  ;;  %p169_p4 = scmp.lt.s32.totalorder (!%p139_p3), %s484_s13, 7 }
   0xc   : > { %s678_s13 = smov (!%p169_p4, %s484_s13), 7 }
   0xd   : > { %s500_s14 = sshll.u32 %s678_s13, 4 }
   0xe   : > { %s173_s17 = scalar_lea.vmem %s670_s0, %s500_s14  ;;  %s643_s20 = scalar_lea.vmem %s672_s2, %s500_s14 }
   0xf LB: >> { %s491_s22 = sshll.u32 %s598_s21, 4  ;;  %s490_s24 = sshll.u32 %s598_s21, 3  ;;  %vm232_vm0 = vcmask 130048   ;;  %s598_s21 = sphi %s596_s21, %s193_s21  }
  0x10   : >> { %s196_s23 = scalar_lea.vmem %s173_s17, %s491_s22  ;;  %s231_s25 = scalar_lea.vmem [#allocation2], %s490_s24 }
  0x11   : >> { %v197_v0 = vld [vmem:[%s196_s23] sm:$0xff]  ;;  %v198_v1 = vld [vmem:[%s196_s23 + $0x8] sm:$0xff]  ;;  %s193_s21 = sadd.s32 1, %s598_s21  }
  0x12   : >> { %199 = vxpose.xlu0.b32.start [1/2] (short) (narrow) %v197_v0, 8  ;;  %p190_p5 = scmp.ge.s32.totalorder %s193_s21, 4  }
  0x13   : > { %v239_v3 = vld [vmem:[%s671_s1 + $0x8] sm:$0xff] (%p190_p5)  ;;  %v238_v4 = vld [vmem:[%s671_s1] sm:$0xff] (%p190_p5)  ;;  %s600_s30 = smov (%p190_p5), 0  }
  0x14   : > { %508 = vmatprep.subr.mxu0 (%p190_p5), %v239_v3  ;;  %518 = vmatprep.subr.mxu1 (%p190_p5), %v239_v3 }
  0x15   : > { %509 = vmatpush3.msra.mxu0 (%p190_p5), %v239_v3  ;;  %520 = vmatpush3.msra.mxu1 (%p190_p5), %v239_v3 }
  0x16   : >> { %200 = vxpose.xlu0.b32.end [2/2] (short) (narrow) %v198_v1, 8  ;;  %510 = vmatprep.subr.mxu0 (%p190_p5), %v238_v4 }
  0x17   : > { %519 = vmatprep.subr.mxu1 (%p190_p5), %v238_v4  ;;  %511 = vmatpush3.msra.mxu0 (%p190_p5), %v238_v4 }
  0x18   : > { %521 = vmatpush3.msra.mxu1 (%p190_p5), %v238_v4 }
  0x8b   : > { %192 = sbr.rel (!%p190_p5) target bundleno = 15 (0xf), region = 76 }
  0x8e   : >> { %v215_v2 = vpop.trf.xlu0 }
  0x8f   : >> { %233 = vst.msk [vmem:[%s231_s25] sm:$0xff] %vm232_vm0, %v215_v2 }
  0x96   : > { %v234_v5 = vld [vmem:[#allocation2] sm:$0xff]  ;;  %v236_v6 = vld [vmem:[#allocation2 + $0x10] sm:$0xff]  ;;  %v235_v7 = vld [vmem:[#allocation2 + $0x8] sm:$0xff] }
  0x97   : > { %v237_v8 = vld [vmem:[#allocation2 + $0x18] sm:$0xff]  ;;  %512 = vmatprep.mubr.msk.f32.mxu0 %vm232_vm0, %v234_v5  ;;  %515 = vmatprep.mubr.msk.f32.mxu1 %vm232_vm0, %v236_v6 }
  0x98   : > { %513 = vmatmul.mubr.msk.f32.vlgmr.msra.gmra.mxu0 %vm232_vm0, %v235_v7  ;;  %516 = vmatmul.mubr.msk.f32.vlgmr.msra.gmra.mxu1 %vm232_vm0, %v237_v8 }
 0x158   : > { %v514_v9 = vpop.f32.mrf.mxu0  ;;  %v517_v10 = vpop.f32.mrf.mxu1 }
 0x159   : > { %339 = vst.msk [vmem:[#allocation3 + $0x8] sm:$0xff] %vm232_vm0, %v514_v9  ;;  %341 = vst.msk [vmem:[#allocation3 + $0x18] sm:$0xff] %vm232_vm0, %v517_v10 }
 0x15a   : > { %v319_v11 = vpop.f32.mrf.mxu0  ;;  %v329_v12 = vpop.f32.mrf.mxu1 }
 0x15b   : > { %338 = vst.msk [vmem:[#allocation3] sm:$0xff] %vm232_vm0, %v319_v11  ;;  %340 = vst.msk [vmem:[#allocation3 + $0x10] sm:$0xff] %vm232_vm0, %v329_v12 }
 0x15c LB: >> { %s496_s3 = sshll.u32 %s602_s30, 3  ;;  %s497_s5 = sshll.u32 %s602_s30, 4  ;;  %vm385_vm1 = vcmask 64512   ;;  %s602_s30 = sphi %s600_s30, %s347_s30  }
 0x15d   : >> { %s349_s4 = scalar_lea.vmem [#allocation3], %s496_s3  ;;  %s384_s6 = scalar_lea.vmem %s643_s20, %s497_s5 }
 0x15e   : >> { %s347_s30 = sadd.s32 1, %s602_s30  }
 0x15f   : >> { %p344_p6 = scmp.ge.s32.totalorder %s347_s30, 4  }
 0x162   : >> { %v350_v13 = vld [vmem:[%s349_s4] sm:$0xff] }
 0x163   : >> { %351 = vxpose.xlu0.b32.start.end [1/1] (short) (narrow) %v350_v13, 16 }
 0x1df   : >> { %v367_v14 = vpop.trf.xlu0 }
 0x1e0   : >> { %386 = vst.msk [vmem:[%s384_s6] sm:$0xff] %vm385_vm1, %v367_v14  ;;  %346 = sbr.rel (!%p344_p6) target bundleno = 348 (0x15c), region = 87 }
 0x1e3   : >> { %v368_v15 = vpop.trf.xlu0 }
 0x1e4   : >> { %387 = vst.msk [vmem:[%s384_s6 + $0x8] sm:$0xff] %vm385_vm1, %v368_v15 }
 0x1e5 PF: > { %s12_s11 = sadd.s32 1, %s594_s11   ;;  %s673_s9 = smov %s590_s10 }
 0x1e6   : > { %p9_p7 = scmp.ge.s32.totalorder %s12_s11, 4   ;;  %s674_s10 = smov %s676_s12 }
 0x1e8   :  { %11 = sbr.rel (!%p9_p7) target bundleno = 2 (0x2), region = 98 }

</bundles_post_ra>
